<compile_context>
chip_gen: v7x
topology: tpu7x:2x2x1
jax: 0.10.0
libtpu: 0.0.40
codegen_flags: <defaults>
</compile_context>

<pallas_src>
import functools

import jax
import jax.numpy as jnp
from jax.experimental import pallas as pl
from jax.experimental.pallas import tpu as pltpu

IN_FEATURES = 784          # 1 * 28 * 28
HIDDEN = 512
NUM_CLASSES = 20
C_PAD = 128                # class dim padded to one full lane tile
NEG_BIG = -1.0e30          # "minus infinity" for padded class columns


def _round_up(n, m):
    return ((n + m - 1) // m) * m


def _cdiv(a, b):
    return (a + b - 1) // b


def classifier_kernel(x_ref, w1_ref, b1_ref, w2_ref, b2_ref, o_ref):
    # x_ref : (TB, 784) f32        w1_ref: (784, 512) bf16   b1_ref: (1, 512) f32
    # w2_ref: (512, 128) bf16      b2_ref: (1, 128)   f32    o_ref : (TB, 128) f32
    x = x_ref[...].astype(jnp.bfloat16)      # cast on the VPU; DMA stays raw f32

    # fc1 + ReLU  (bf16 operands, f32 accumulation on the MXU)
    h = jnp.dot(x, w1_ref[...], preferred_element_type=jnp.float32) + b1_ref[...]
    h = jnp.maximum(h, 0.0)

    # Dropout(p=0.2): identity at inference time.
    # TODO(synk): training-mode dropout would use pltpu.prng_seed + prng_random_bits.

    # fc2 (padded to 128 classes; padded columns carry bias = -1e30)
    logits = jnp.dot(h.astype(jnp.bfloat16), w2_ref[...],
                     preferred_element_type=jnp.float32) + b2_ref[...]

    # log_softmax over the class dim (padded lanes exp() to exact zero)
    m = jnp.max(logits, axis=-1, keepdims=True)
    shifted = logits - m
    lse = jnp.log(jnp.sum(jnp.exp(shifted), axis=-1, keepdims=True))
    o_ref[...] = shifted - lse


def prepare_params(w1, b1, w2, b2):
    """One-time weight prep (transpose + pad + cast). Do NOT call per forward."""
    # w1: (512, 784), b1: (512,), w2: (20, 512), b2: (20,)
    w1p = w1.T.astype(jnp.bfloat16)                      # (784, 512), no K pad needed
    b1p = b1.reshape(1, HIDDEN).astype(jnp.float32)

    w2p = jnp.zeros((HIDDEN, C_PAD), jnp.bfloat16)
    w2p = w2p.at[:, :NUM_CLASSES].set(w2.T.astype(jnp.bfloat16))
    b2p = jnp.full((1, C_PAD), NEG_BIG, jnp.float32)
    b2p = b2p.at[0, :NUM_CLASSES].set(b2.astype(jnp.float32))
    return w1p, b1p, w2p, b2p


@functools.partial(jax.jit, static_argnames=("max_tile",))
def classifier_forward(x_nchw, params, *, max_tile=512):
    """x_nchw: (B, 1, 28, 28) float32.  Returns (B, 20) f32 log-probs."""
    w1p, b1p, w2p, b2p = params
    B = x_nchw.shape[0]

    # Batch tiling: >=2 tiles when possible (v7x megacore), each <= max_tile
    # rows, and sized ~evenly so batch padding is at most the 8-row round-up.
    rows = _round_up(B, 8)
    num_tiles = max(2, _cdiv(rows, max_tile))
    TB = min(max_tile, _round_up(_cdiv(rows, num_tiles), 8))
    pB = _round_up(B, TB)

    x = x_nchw.reshape(B, -1)                # (B, 784) f32 — no pad-to-896/bf16 copy
    if pB != B:
        x = jnp.pad(x, ((0, pB - B), (0, 0)))

    out = pl.pallas_call(
        classifier_kernel,
        out_shape=jax.ShapeDtypeStruct((pB, C_PAD), jnp.float32),
        grid=(pB // TB,),
        in_specs=[
            pl.BlockSpec((TB, IN_FEATURES), lambda i: (i, 0)),      # x tile (f32)
            pl.BlockSpec((IN_FEATURES, HIDDEN), lambda i: (0, 0),
                         pipeline_mode=pl.Buffered(1)),             # W1^T resident
            pl.BlockSpec((1, HIDDEN), lambda i: (0, 0),
                         pipeline_mode=pl.Buffered(1)),             # b1   resident
            pl.BlockSpec((HIDDEN, C_PAD), lambda i: (0, 0),
                         pipeline_mode=pl.Buffered(1)),             # W2^T resident
            pl.BlockSpec((1, C_PAD), lambda i: (0, 0),
                         pipeline_mode=pl.Buffered(1)),             # b2   resident
        ],
        out_specs=pl.BlockSpec((TB, C_PAD), lambda i: (i, 0)),
        compiler_params=pltpu.CompilerParams(
            dimension_semantics=("parallel",),
            # Only needed if the tile is pushed past 512 rows (e.g. v6e 1024),
            # where v5e's 16 MiB scoped-VMEM default would otherwise reject it.
            vmem_limit_bytes=(32 * 1024 * 1024) if TB > 512 else None),
    )(x, w1p, b1p, w2p, b2p)

    return out[:B, :NUM_CLASSES]


def init_params(key):
    """Deterministic parameter init matching nn.Linear shapes."""
    k1, k2, k3, k4 = jax.random.split(key, 4)
    bound1 = 1.0 / jnp.sqrt(784.0)
    w1 = jax.random.uniform(k1, (HIDDEN, IN_FEATURES), jnp.float32, -bound1, bound1)
    b1 = jax.random.uniform(k2, (HIDDEN,), jnp.float32, -bound1, bound1)
    bound2 = 1.0 / jnp.sqrt(512.0)
    w2 = jax.random.uniform(k3, (NUM_CLASSES, HIDDEN), jnp.float32, -bound2, bound2)
    b2 = jax.random.uniform(k4, (NUM_CLASSES,), jnp.float32, -bound2, bound2)
    return w1, b1, w2, b2


def reference_forward(x_nchw, w1, b1, w2, b2):
    """Pure-JAX reference with the same bf16-matmul / f32-accumulate recipe."""
    B = x_nchw.shape[0]
    x = x_nchw.reshape(B, -1).astype(jnp.bfloat16)
    h = jnp.dot(x, w1.T.astype(jnp.bfloat16),
                preferred_element_type=jnp.float32) + b1
    h = jnp.maximum(h, 0.0)
    logits = jnp.dot(h.astype(jnp.bfloat16), w2.T.astype(jnp.bfloat16),
                     preferred_element_type=jnp.float32) + b2
    return jax.nn.log_softmax(logits, axis=1)


def reference_forward_f32(x_nchw, w1, b1, w2, b2):
    """Full-f32 reference (semantics of the original PyTorch module)."""
    B = x_nchw.shape[0]
    x = x_nchw.reshape(B, -1)
    h = jnp.maximum(x @ w1.T + b1, 0.0)
    return jax.nn.log_softmax(h @ w2.T + b2, axis=1)


if __name__ == "__main__":
    key = jax.random.PRNGKey(0)
    k_x, k_p = jax.random.split(key)

    B = 2
    x = jax.random.normal(k_x, (B, 1, 28, 28), jnp.float32)   # Fashion-MNIST-like
    w1, b1, w2, b2 = init_params(k_p)
    params = prepare_params(w1, b1, w2, b2)                    # one-time prep

    out = classifier_forward(x, params)
    out = jax.block_until_ready(out)
    assert out.shape == (B, NUM_CLASSES)

    ref_bf16 = reference_forward(x, w1, b1, w2, b2)
    assert jnp.allclose(out, ref_bf16, atol=5e-3, rtol=5e-3), "mismatch vs bf16 reference"

    ref_f32 = reference_forward_f32(x, w1, b1, w2, b2)
    assert jnp.allclose(out, ref_f32, atol=5e-2, rtol=5e-2), "mismatch vs f32 reference"

    print("KERNEL_OK")
</pallas_src>

<mosaic_0001>
module attributes {stable_mosaic.version = 11 : i64} {
  func.func @classifier_kernel(%arg0: i32, %arg1: memref<8x784xf32, #tpu.memory_space<vmem>>, %arg2: memref<784x512xbf16, #tpu.memory_space<vmem>>, %arg3: memref<1x512xf32, #tpu.memory_space<vmem>>, %arg4: memref<512x128xbf16, #tpu.memory_space<vmem>>, %arg5: memref<1x128xf32, #tpu.memory_space<vmem>>, %arg6: memref<8x128xf32, #tpu.memory_space<vmem>>) attributes {dimension_semantics = [#tpu.dimension_semantics<parallel>], iteration_bounds = array<i64: 1>, scalar_prefetch = 0 : i64, scratch_operands = 0 : i64, tpu.core_type = #tpu.core_type<tc>, window_params = [{transform_indices = @transform_0, window_bounds = array<i64: 8, 784>}, {pipeline_mode = #tpu.pipeline_mode<synchronous>, transform_indices = @transform_1, window_bounds = array<i64: 784, 512>}, {pipeline_mode = #tpu.pipeline_mode<synchronous>, transform_indices = @transform_2, window_bounds = array<i64: 1, 512>}, {pipeline_mode = #tpu.pipeline_mode<synchronous>, transform_indices = @transform_3, window_bounds = array<i64: 512, 128>}, {pipeline_mode = #tpu.pipeline_mode<synchronous>, transform_indices = @transform_4, window_bounds = array<i64: 1, 128>}, {transform_indices = @transform_5, window_bounds = array<i64: 8, 128>}]} {
    %c0 = arith.constant 0 : index
    %c0_0 = arith.constant 0 : index
    %0 = vector.load %arg1[%c0, %c0_0] : memref<8x784xf32, #tpu.memory_space<vmem>>, vector<8x784xf32>
    %1 = arith.truncf %0 : vector<8x784xf32> to vector<8x784xbf16>
    %c0_1 = arith.constant 0 : index
    %c0_2 = arith.constant 0 : index
    %2 = vector.load %arg2[%c0_1, %c0_2] : memref<784x512xbf16, #tpu.memory_space<vmem>>, vector<784x512xbf16>
    %cst = arith.constant dense<0.000000e+00> : vector<8x512xf32>
    %3 = tpu.matmul %1, %2, %cst {dimension_numbers = #tpu.dot_dimension_numbers<[1], [0], [0], [1], [0, 0, 1, 1], [], []>} : vector<8x784xbf16>, vector<784x512xbf16>, vector<8x512xf32> -> vector<8x512xf32>
    %c0_3 = arith.constant 0 : index
    %c0_4 = arith.constant 0 : index
    %4 = vector.load %arg3[%c0_3, %c0_4] : memref<1x512xf32, #tpu.memory_space<vmem>>, vector<1x512xf32>
    %5 = vector.broadcast %4 : vector<1x512xf32> to vector<8x512xf32>
    %6 = arith.addf %3, %5 : vector<8x512xf32>
    %cst_5 = arith.constant 0.000000e+00 : f32
    %7 = vector.broadcast %cst_5 : f32 to vector<8x512xf32>
    %8 = arith.maximumf %6, %7 : vector<8x512xf32>
    %9 = arith.truncf %8 : vector<8x512xf32> to vector<8x512xbf16>
    %c0_6 = arith.constant 0 : index
    %c0_7 = arith.constant 0 : index
    %10 = vector.load %arg4[%c0_6, %c0_7] : memref<512x128xbf16, #tpu.memory_space<vmem>>, vector<512x128xbf16>
    %cst_8 = arith.constant dense<0.000000e+00> : vector<8x128xf32>
    %11 = tpu.matmul %9, %10, %cst_8 {dimension_numbers = #tpu.dot_dimension_numbers<[1], [0], [0], [1], [0, 0, 1, 1], [], []>} : vector<8x512xbf16>, vector<512x128xbf16>, vector<8x128xf32> -> vector<8x128xf32>
    %c0_9 = arith.constant 0 : index
    %c0_10 = arith.constant 0 : index
    %12 = vector.load %arg5[%c0_9, %c0_10] : memref<1x128xf32, #tpu.memory_space<vmem>>, vector<1x128xf32>
    %13 = vector.broadcast %12 : vector<1x128xf32> to vector<8x128xf32>
    %14 = arith.addf %11, %13 : vector<8x128xf32>
    %cst_11 = arith.constant dense<0xFF800000> : vector<8xf32>
    %15 = vector.multi_reduction <maximumf>, %14, %cst_11 [1] : vector<8x128xf32> to vector<8xf32>
    %16 = vector.shape_cast %15 : vector<8xf32> to vector<8x1xf32>
    %17 = vector.broadcast %16 : vector<8x1xf32> to vector<8x128xf32>
    %18 = arith.subf %14, %17 : vector<8x128xf32>
    %19 = math.exp %18 : vector<8x128xf32>
    %cst_12 = arith.constant dense<0.000000e+00> : vector<8xf32>
    %20 = vector.multi_reduction <add>, %19, %cst_12 [1] : vector<8x128xf32> to vector<8xf32>
    %21 = vector.shape_cast %20 : vector<8xf32> to vector<8x1xf32>
    %22 = math.log %21 : vector<8x1xf32>
    %23 = vector.broadcast %22 : vector<8x1xf32> to vector<8x128xf32>
    %24 = arith.subf %18, %23 : vector<8x128xf32>
    %c0_13 = arith.constant 0 : index
    %c0_14 = arith.constant 0 : index
    %25 = vector.load %arg6[%c0_13, %c0_14] : memref<8x128xf32, #tpu.memory_space<vmem>>, vector<8x128xf32>
    tpu.vector_store %arg6[%c0_13, %c0_14], %24 {strides = array<i32>} : memref<8x128xf32, #tpu.memory_space<vmem>>, vector<8x128xf32>,
    return
  }
  func.func @transform_0(%arg0: i32) -> (i32, i32) {
    %c0_i32 = arith.constant 0 : i32
    %c0_i32_0 = arith.constant 0 : i32
    return %arg0, %c0_i32 : i32, i32
  }
  func.func @transform_1(%arg0: i32) -> (i32, i32) {
    %c0_i32 = arith.constant 0 : i32
    %c0_i32_0 = arith.constant 0 : i32
    %c0_i32_1 = arith.constant 0 : i32
    return %c0_i32, %c0_i32_0 : i32, i32
  }
  func.func @transform_2(%arg0: i32) -> (i32, i32) {
    %c0_i32 = arith.constant 0 : i32
    %c0_i32_0 = arith.constant 0 : i32
    %c0_i32_1 = arith.constant 0 : i32
    return %c0_i32, %c0_i32_0 : i32, i32
  }
  func.func @transform_3(%arg0: i32) -> (i32, i32) {
    %c0_i32 = arith.constant 0 : i32
    %c0_i32_0 = arith.constant 0 : i32
    %c0_i32_1 = arith.constant 0 : i32
    return %c0_i32, %c0_i32_0 : i32, i32
  }
  func.func @transform_4(%arg0: i32) -> (i32, i32) {
    %c0_i32 = arith.constant 0 : i32
    %c0_i32_0 = arith.constant 0 : i32
    %c0_i32_1 = arith.constant 0 : i32
    return %c0_i32, %c0_i32_0 : i32, i32
  }
  func.func @transform_5(%arg0: i32) -> (i32, i32) {
    %c0_i32 = arith.constant 0 : i32
    %c0_i32_0 = arith.constant 0 : i32
    return %arg0, %c0_i32 : i32, i32
  }
}

</mosaic_0001>

<bundles_post_ra>
// kernel: classifier_forward.1
= control target key start
LH: loop header
LB: loop body
LE: loop exit
PB: predicated region body
PF: predicated region fallthrough
CT: control target
= control target key end

     0   :  { %10 = vsyncpa [#allocation3], 0  ;;  %s2607_s18 = smov [#allocation2]   ;;  %s2779_s0 = inlined_call_operand.vmem [shape: f32[8,784], index: 0, kind: input, shape index: {}]   ;;  %s2780_s1 = inlined_call_operand.hbm [shape: bf16[784,512], index: 1, kind: input, shape index: {}]   ;;  %s2781_s2 = inlined_call_operand.vmem [shape: f32[1,512], index: 2, kind: input, shape index: {}]   ;;  %s2782_s3 = inlined_call_operand.vmem [shape: bf16[512,128], index: 3, kind: input, shape index: {}]   ;;  %s2783_s4 = inlined_call_operand.vmem [shape: f32[1,128], index: 4, kind: input, shape index: {}]   ;;  %s2784_s5 = inlined_call_operand.vmem [shape: f32[8,128], index: 5, kind: output, shape index: {}]  }
   0x1   :  { %s18_s19 = sshll.u32 %s2607_s18, 4  ;;  %s2583_s22 = scalar_lea.hbm %s2780_s1, 25088  ;;  %s19_s19 = int_to_ptr.vmem [resolvable:$true] %s18_s19 }
   0x2   :  { %p2584_p0 = scmp.ne.s32.totalorder %s2780_s1, %s2583_s22  ;;  %p2587_p1 = scmp.lt.u32.totalorder %s2583_s22, %s2780_s1 }
   0x4   :  { %p2589_p2 = pnand %p2587_p1, %p2584_p0 }
   0x6   :  { %2592 = shalt.err (!%p2589_p2)
}
   0x7   :  { %s2593_s27 = scalar_lea.vmem %s19_s19, 25088  ;;  %p2598_p4 = scmp.lt.s32.totalorder %s19_s19, %s19_s19 }
   0x8   :  { %p2594_p3 = scmp.ne.s32.totalorder %s19_s19, %s2593_s27  ;;  %p2599_p5 = scmp.lt.s32.totalorder %s2593_s27, %s2593_s27 }
   0xa   :  { %p2600_p6 = por %p2599_p5, %p2598_p4 }
   0xc   :  { %p2601_p7 = pnand %p2600_p6, %p2594_p3 }
   0xe   :  { %2604 = shalt.err (!%p2601_p7)
}
   0xf   :  { %s2608_s28 = smov 256   ;;  %s2609_s29 = smov 16  }
  0x10   :  { %24 = dma.hbm_to_vmem [thread:$0]  %s2780_s1, 25088, %s19_s19, [#allocation3], %s2608_s28, %s2608_s28, %s2609_s29  }
  0x11   :  { %2605 = dma.done.wait [#allocation3], 25088  }
  0x12   :  { %2606 = vsyncadd [#allocation3], 4294942208  ;;  %v2253_v0 = vld [vmem:[#allocation2 + $0x4] ss:$16 sps:$4 sm:$0xff]   ;;  %v2255_v1 = vld [vmem:[#allocation2 + $0xc] ss:$16 sps:$4 sm:$0xff]  }
  0x13   :  { %1251 = vmatprep.subr.bf16.mxu0 %v2253_v0  ;;  %v2257_v2 = vld [vmem:[#allocation2] ss:$16 sps:$4 sm:$0xff]   ;;  %v2258_v3 = vld [vmem:[#allocation2 + $0x8] ss:$16 sps:$4 sm:$0xff]   ;;  %1415 = vmatprep.subr.bf16.mxu1 %v2255_v1  ;;  %v2259_v4 = vld [vmem:[#allocation2 + $0x24] ss:$16 sps:$4 sm:$0xff]  }
  0x14   :  { %1252 = vmatpush1.bf16.msra.mxu0 %v2257_v2  ;;  %1416 = vmatpush1.bf16.msra.mxu1 %v2258_v3  ;;  %v2261_v5 = vld [vmem:[#allocation2 + $0x2c] ss:$16 sps:$4 sm:$0xff]   ;;  %v2263_v6 = vld [vmem:[#allocation2 + $0x20] ss:$16 sps:$4 sm:$0xff]   ;;  %v2264_v7 = vld [vmem:[#allocation2 + $0x28] ss:$16 sps:$4 sm:$0xff]  }
  0x15   :  { %1253 = vmatprep.subr.bf16.mxu0 %v2259_v4  ;;  %1417 = vmatprep.subr.bf16.mxu1 %v2261_v5  ;;  %v2265_v8 = vld [vmem:[#allocation2 + $0x44] ss:$16 sps:$4 sm:$0xff]   ;;  %v2267_v9 = vld [vmem:[#allocation2 + $0x4c] ss:$16 sps:$4 sm:$0xff]   ;;  %v2269_v10 = vld [vmem:[#allocation2 + $0x40] ss:$16 sps:$4 sm:$0xff]  }
  0x16   :  { %v2270_v11 = vld [vmem:[#allocation2 + $0x48] ss:$16 sps:$4 sm:$0xff]   ;;  %v2271_v12 = vld [vmem:[#allocation2 + $0x64] ss:$16 sps:$4 sm:$0xff]   ;;  %v2273_v13 = vld [vmem:[#allocation2 + $0x6c] ss:$16 sps:$4 sm:$0xff]  }
  0x17   :  { %v2275_v14 = vld [vmem:[#allocation2 + $0x60] ss:$16 sps:$4 sm:$0xff]   ;;  %v2276_v15 = vld [vmem:[#allocation2 + $0x68] ss:$16 sps:$4 sm:$0xff]   ;;  %v2277_v16 = vld [vmem:[#allocation2 + $0x84] ss:$16 sps:$4 sm:$0xff]  }
  0x18   :  { %1254 = vmatpush1.bf16.msra.mxu0 %v2263_v6  ;;  %1418 = vmatpush1.bf16.msra.mxu1 %v2264_v7  ;;  %v2279_v17 = vld [vmem:[#allocation2 + $0x8c] ss:$16 sps:$4 sm:$0xff]   ;;  %v2281_v18 = vld [vmem:[#allocation2 + $0x80] ss:$16 sps:$4 sm:$0xff]   ;;  %v2282_v19 = vld [vmem:[#allocation2 + $0x88] ss:$16 sps:$4 sm:$0xff]  }
  0x19   :  { %1255 = vmatprep.subr.bf16.mxu0 %v2265_v8  ;;  %1419 = vmatprep.subr.bf16.mxu1 %v2267_v9  ;;  %v2283_v20 = vld [vmem:[#allocation2 + $0xa4] ss:$16 sps:$4 sm:$0xff]   ;;  %v2285_v21 = vld [vmem:[#allocation2 + $0xac] ss:$16 sps:$4 sm:$0xff]   ;;  %v2287_v22 = vld [vmem:[#allocation2 + $0xa0] ss:$16 sps:$4 sm:$0xff]  }
  0x1a   :  { %v2288_v23 = vld [vmem:[#allocation2 + $0xa8] ss:$16 sps:$4 sm:$0xff]   ;;  %v2289_v24 = vld [vmem:[#allocation2 + $0xc4] ss:$16 sps:$4 sm:$0xff]   ;;  %v2291_v25 = vld [vmem:[#allocation2 + $0xcc] ss:$16 sps:$4 sm:$0xff]  }
  0x1b   :  { %v2293_v26 = vld [vmem:[#allocation2 + $0xc0] ss:$16 sps:$4 sm:$0xff]   ;;  %v2294_v27 = vld [vmem:[#allocation2 + $0xc8] ss:$16 sps:$4 sm:$0xff]   ;;  %v2295_v28 = vld [vmem:[#allocation2 + $0xe4] ss:$16 sps:$4 sm:$0xff]  }
  0x1c   :  { %1256 = vmatpush1.bf16.msra.mxu0 %v2269_v10  ;;  %1420 = vmatpush1.bf16.msra.mxu1 %v2270_v11  ;;  %v2297_v29 = vld [vmem:[#allocation2 + $0xec] ss:$16 sps:$4 sm:$0xff]   ;;  %v2299_v30 = vld [vmem:[#allocation2 + $0xe0] ss:$16 sps:$4 sm:$0xff]   ;;  %v2300_v31 = vld [vmem:[#allocation2 + $0xe8] ss:$16 sps:$4 sm:$0xff]  }
  0x1d   :  { %1257 = vmatprep.subr.bf16.mxu0 %v2271_v12  ;;  %1421 = vmatprep.subr.bf16.mxu1 %v2273_v13  ;;  %v2301_v32 = vld [vmem:[#allocation2 + $0x104] ss:$16 sps:$4 sm:$0xff]   ;;  %v2303_v33 = vld [vmem:[#allocation2 + $0x10c] ss:$16 sps:$4 sm:$0xff]   ;;  %v2305_v34 = vld [vmem:[#allocation2 + $0x100] ss:$16 sps:$4 sm:$0xff]  }
  0x1e   :  { %v2306_v35 = vld [vmem:[#allocation2 + $0x108] ss:$16 sps:$4 sm:$0xff]   ;;  %v2307_v36 = vld [vmem:[#allocation2 + $0x124] ss:$16 sps:$4 sm:$0xff]   ;;  %v2309_v37 = vld [vmem:[#allocation2 + $0x12c] ss:$16 sps:$4 sm:$0xff]  }
  0x1f   :  { %v2311_v38 = vld [vmem:[#allocation2 + $0x120] ss:$16 sps:$4 sm:$0xff]   ;;  %v2312_v39 = vld [vmem:[#allocation2 + $0x128] ss:$16 sps:$4 sm:$0xff]   ;;  %v2313_v40 = vld [vmem:[#allocation2 + $0x144] ss:$16 sps:$4 sm:$0xff]  }
  0x20   :  { %1258 = vmatpush1.bf16.msra.mxu0 %v2275_v14  ;;  %1422 = vmatpush1.bf16.msra.mxu1 %v2276_v15  ;;  %v2315_v41 = vld [vmem:[#allocation2 + $0x14c] ss:$16 sps:$4 sm:$0xff]   ;;  %v2317_v42 = vld [vmem:[#allocation2 + $0x140] ss:$16 sps:$4 sm:$0xff]   ;;  %v2318_v43 = vld [vmem:[#allocation2 + $0x148] ss:$16 sps:$4 sm:$0xff]  }
  0x21   :  { %1259 = vmatprep.subr.bf16.mxu0 %v2277_v16  ;;  %1423 = vmatprep.subr.bf16.mxu1 %v2279_v17  ;;  %v2319_v44 = vld [vmem:[#allocation2 + $0x164] ss:$16 sps:$4 sm:$0xff]   ;;  %v2321_v45 = vld [vmem:[#allocation2 + $0x16c] ss:$16 sps:$4 sm:$0xff]   ;;  %v2323_v47 = vld [vmem:[#allocation2 + $0x160] ss:$16 sps:$4 sm:$0xff]  }
  0x22   :  { %v36_v46 = vld [vmem:[%s2779_s0 + $0x8] sm:$0xff]  ;;  %v2325_v50 = vld [vmem:[#allocation2 + $0x184] ss:$16 sps:$4 sm:$0xff]   ;;  %v2329_v52 = vld [vmem:[#allocation2 + $0x180] ss:$16 sps:$4 sm:$0xff]   ;;  %vm1247_vm0 = vcmask 130048  }
  0x23   :  { %v43_v48 = vpack.c.bf16 %v36_v46, %v36_v46  ;;  %v2324_v49 = vld [vmem:[#allocation2 + $0x168] ss:$16 sps:$4 sm:$0xff]   ;;  %v2327_v51 = vld [vmem:[#allocation2 + $0x18c] ss:$16 sps:$4 sm:$0xff]   ;;  %v2331_v54 = vld [vmem:[#allocation2 + $0x1a4] ss:$16 sps:$4 sm:$0xff]  }
  0x24   :  { %1260 = vmatpush1.bf16.msra.mxu0 %v2281_v18  ;;  %1424 = vmatpush1.bf16.msra.mxu1 %v2282_v19  ;;  %v2330_v53 = vld [vmem:[#allocation2 + $0x188] ss:$16 sps:$4 sm:$0xff]   ;;  %v2333_v55 = vld [vmem:[#allocation2 + $0x1ac] ss:$16 sps:$4 sm:$0xff]   ;;  %v2335_v56 = vld [vmem:[#allocation2 + $0x1a0] ss:$16 sps:$4 sm:$0xff]  }
  0x25   :  { %1261 = vmatprep.subr.bf16.mxu0 %v2283_v20  ;;  %1425 = vmatprep.subr.bf16.mxu1 %v2285_v21  ;;  %v2336_v57 = vld [vmem:[#allocation2 + $0x1a8] ss:$16 sps:$4 sm:$0xff]   ;;  %v2337_v58 = vld [vmem:[#allocation2 + $0x1c4] ss:$16 sps:$4 sm:$0xff]   ;;  %v2339_v59 = vld [vmem:[#allocation2 + $0x1cc] ss:$16 sps:$4 sm:$0xff]  }
  0x26   :  { %1283 = vmatprep.mubr.bf16.mxu0 %v43_v48  ;;  %1447 = vmatprep.mubr.bf16.mxu1 %v43_v48  ;;  %v2341_v60 = vld [vmem:[#allocation2 + $0x1c0] ss:$16 sps:$4 sm:$0xff]   ;;  %v2342_v61 = vld [vmem:[#allocation2 + $0x1c8] ss:$16 sps:$4 sm:$0xff]   ;;  %v2343_v62 = vld [vmem:[#allocation2 + $0x1e4] ss:$16 sps:$4 sm:$0xff]  }
  0x27   :  { %v2345_v63 = vld [vmem:[#allocation2 + $0x1ec] ss:$16 sps:$4 sm:$0xff]   ;;  %v2347_v0 = vld [vmem:[#allocation2 + $0x1e0] ss:$16 sps:$4 sm:$0xff]   ;;  %v2348_v1 = vld [vmem:[#allocation2 + $0x1e8] ss:$16 sps:$4 sm:$0xff]  }
  0x28   :  { %1262 = vmatpush1.bf16.msra.mxu0 %v2287_v22  ;;  %1426 = vmatpush1.bf16.msra.mxu1 %v2288_v23  ;;  %v35_v2 = vld [vmem:[%s2779_s0] sm:$0xff]  ;;  %v2354_v4 = vld [vmem:[#allocation2 + $0x20c] ss:$16 sps:$4 sm:$0xff]   ;;  %v2352_v7 = vld [vmem:[#allocation2 + $0x208] ss:$16 sps:$4 sm:$0xff]  }
  0x29   :  { %1263 = vmatprep.subr.bf16.mxu0 %v2289_v24  ;;  %1427 = vmatprep.subr.bf16.mxu1 %v2291_v25  ;;  %v2351_v3 = vld [vmem:[#allocation2 + $0x204] ss:$16 sps:$4 sm:$0xff]   ;;  %v42_v5 = vpack.c.bf16 %v35_v2, %v35_v2  ;;  %v2349_v6 = vld [vmem:[#allocation2 + $0x200] ss:$16 sps:$4 sm:$0xff]   ;;  %v2360_v9 = vld [vmem:[#allocation2 + $0x22c] ss:$16 sps:$4 sm:$0xff]  }
  0x2a   :  { %v2357_v8 = vld [vmem:[#allocation2 + $0x224] ss:$16 sps:$4 sm:$0xff]   ;;  %v2355_v10 = vld [vmem:[#allocation2 + $0x220] ss:$16 sps:$4 sm:$0xff]   ;;  %v2358_v11 = vld [vmem:[#allocation2 + $0x228] ss:$16 sps:$4 sm:$0xff]  }
  0x2b   :  { %v2363_v12 = vld [vmem:[#allocation2 + $0x244] ss:$16 sps:$4 sm:$0xff]   ;;  %v2366_v13 = vld [vmem:[#allocation2 + $0x24c] ss:$16 sps:$4 sm:$0xff]   ;;  %v2361_v14 = vld [vmem:[#allocation2 + $0x240] ss:$16 sps:$4 sm:$0xff]  }
  0x2c   :  { %1264 = vmatpush1.bf16.msra.mxu0 %v2293_v26  ;;  %1428 = vmatpush1.bf16.msra.mxu1 %v2294_v27  ;;  %v2364_v15 = vld [vmem:[#allocation2 + $0x248] ss:$16 sps:$4 sm:$0xff]   ;;  %v2369_v16 = vld [vmem:[#allocation2 + $0x264] ss:$16 sps:$4 sm:$0xff]   ;;  %v2372_v17 = vld [vmem:[#allocation2 + $0x26c] ss:$16 sps:$4 sm:$0xff]  }
  0x2d   :  { %1265 = vmatprep.subr.bf16.mxu0 %v2295_v28  ;;  %1429 = vmatprep.subr.bf16.mxu1 %v2297_v29  ;;  %v2367_v18 = vld [vmem:[#allocation2 + $0x260] ss:$16 sps:$4 sm:$0xff]   ;;  %v2370_v19 = vld [vmem:[#allocation2 + $0x268] ss:$16 sps:$4 sm:$0xff]   ;;  %v2375_v20 = vld [vmem:[#allocation2 + $0x284] ss:$16 sps:$4 sm:$0xff]  }
  0x2e   :  { %v2378_v21 = vld [vmem:[#allocation2 + $0x28c] ss:$16 sps:$4 sm:$0xff]   ;;  %v2373_v22 = vld [vmem:[#allocation2 + $0x280] ss:$16 sps:$4 sm:$0xff]   ;;  %v2376_v23 = vld [vmem:[#allocation2 + $0x288] ss:$16 sps:$4 sm:$0xff]  }
  0x2f   :  { %v2381_v24 = vld [vmem:[#allocation2 + $0x2a4] ss:$16 sps:$4 sm:$0xff]   ;;  %v2384_v25 = vld [vmem:[#allocation2 + $0x2ac] ss:$16 sps:$4 sm:$0xff]   ;;  %v2379_v26 = vld [vmem:[#allocation2 + $0x2a0] ss:$16 sps:$4 sm:$0xff]  }
  0x30   :  { %1266 = vmatpush1.bf16.msra.mxu0 %v2299_v30  ;;  %1430 = vmatpush1.bf16.msra.mxu1 %v2300_v31  ;;  %v2382_v27 = vld [vmem:[#allocation2 + $0x2a8] ss:$16 sps:$4 sm:$0xff]   ;;  %v2387_v28 = vld [vmem:[#allocation2 + $0x2c4] ss:$16 sps:$4 sm:$0xff]   ;;  %v2390_v29 = vld [vmem:[#allocation2 + $0x2cc] ss:$16 sps:$4 sm:$0xff]  }
  0x31   :  { %1267 = vmatprep.subr.bf16.mxu0 %v2301_v32  ;;  %1431 = vmatprep.subr.bf16.mxu1 %v2303_v33  ;;  %v38_v30 = vld [vmem:[%s2779_s0 + $0x18] sm:$0xff]  ;;  %v2385_v31 = vld [vmem:[#allocation2 + $0x2c0] ss:$16 sps:$4 sm:$0xff]   ;;  %v2411_v46 = vld [vmem:[#allocation2 + $0x344] ss:$16 sps:$4 sm:$0xff]  }
  0x32   :  { %v45_v32 = vpack.c.bf16 %v38_v30, %v38_v30  ;;  %v2388_v33 = vld [vmem:[#allocation2 + $0x2c8] ss:$16 sps:$4 sm:$0xff]   ;;  %v2409_v48 = vld [vmem:[#allocation2 + $0x340] ss:$16 sps:$4 sm:$0xff]   ;;  %v2441_v2 = vld [vmem:[#allocation2 + $0x3e4] ss:$16 sps:$4 sm:$0xff]  }
  0x33   :  { %v2477_v30 = vld [vmem:[#allocation2 + $0x4a4] ss:$16 sps:$4 sm:$0xff]  }
  0x34   :  { %1268 = vmatpush1.bf16.msra.mxu0 %v2305_v34  ;;  %1432 = vmatpush1.bf16.msra.mxu1 %v2306_v35  ;;  %v2393_v34 = vld [vmem:[#allocation2 + $0x2e4] ss:$16 sps:$4 sm:$0xff]   ;;  %v2396_v35 = vld [vmem:[#allocation2 + $0x2ec] ss:$16 sps:$4 sm:$0xff]  }
  0x35   :  { %1269 = vmatprep.subr.bf16.mxu0 %v2307_v36  ;;  %1433 = vmatprep.subr.bf16.mxu1 %v2309_v37  ;;  %v2391_v36 = vld [vmem:[#allocation2 + $0x2e0] ss:$16 sps:$4 sm:$0xff]   ;;  %v2394_v37 = vld [vmem:[#allocation2 + $0x2e8] ss:$16 sps:$4 sm:$0xff]  }
  0x38   :  { %1270 = vmatpush1.bf16.msra.mxu0 %v2311_v38  ;;  %1434 = vmatpush1.bf16.msra.mxu1 %v2312_v39  ;;  %v2399_v38 = vld [vmem:[#allocation2 + $0x304] ss:$16 sps:$4 sm:$0xff]   ;;  %v2402_v39 = vld [vmem:[#allocation2 + $0x30c] ss:$16 sps:$4 sm:$0xff]  }
  0x39   :  { %1271 = vmatprep.subr.bf16.mxu0 %v2313_v40  ;;  %1435 = vmatprep.subr.bf16.mxu1 %v2315_v41  ;;  %v2397_v40 = vld [vmem:[#allocation2 + $0x300] ss:$16 sps:$4 sm:$0xff]   ;;  %v2400_v41 = vld [vmem:[#allocation2 + $0x308] ss:$16 sps:$4 sm:$0xff]  }
  0x3c   :  { %1272 = vmatpush1.bf16.msra.mxu0 %v2317_v42  ;;  %1436 = vmatpush1.bf16.msra.mxu1 %v2318_v43  ;;  %v2405_v42 = vld [vmem:[#allocation2 + $0x324] ss:$16 sps:$4 sm:$0xff]   ;;  %v2408_v43 = vld [vmem:[#allocation2 + $0x32c] ss:$16 sps:$4 sm:$0xff]  }
  0x3d   :  { %1273 = vmatprep.subr.bf16.mxu0 %v2319_v44  ;;  %1437 = vmatprep.subr.bf16.mxu1 %v2321_v45  ;;  %v2403_v44 = vld [vmem:[#allocation2 + $0x320] ss:$16 sps:$4 sm:$0xff]   ;;  %v2406_v45 = vld [vmem:[#allocation2 + $0x328] ss:$16 sps:$4 sm:$0xff]  }
  0x40   :  { %1274 = vmatpush1.bf16.msra.mxu0 %v2323_v47  ;;  %1438 = vmatpush1.bf16.msra.mxu1 %v2324_v49  ;;  %v2414_v47 = vld [vmem:[#allocation2 + $0x34c] ss:$16 sps:$4 sm:$0xff]   ;;  %v2412_v49 = vld [vmem:[#allocation2 + $0x348] ss:$16 sps:$4 sm:$0xff]  }
  0x41   :  { %1275 = vmatprep.subr.bf16.mxu0 %v2325_v50  ;;  %1439 = vmatprep.subr.bf16.mxu1 %v2327_v51  ;;  %v2417_v50 = vld [vmem:[#allocation2 + $0x364] ss:$16 sps:$4 sm:$0xff]   ;;  %v2420_v51 = vld [vmem:[#allocation2 + $0x36c] ss:$16 sps:$4 sm:$0xff]  }
  0x44   :  { %1276 = vmatpush1.bf16.msra.mxu0 %v2329_v52  ;;  %1440 = vmatpush1.bf16.msra.mxu1 %v2330_v53  ;;  %v2415_v52 = vld [vmem:[#allocation2 + $0x360] ss:$16 sps:$4 sm:$0xff]   ;;  %v2418_v53 = vld [vmem:[#allocation2 + $0x368] ss:$16 sps:$4 sm:$0xff]  }
  0x45   :  { %1277 = vmatprep.subr.bf16.mxu0 %v2331_v54  ;;  %1441 = vmatprep.subr.bf16.mxu1 %v2333_v55  ;;  %v2423_v54 = vld [vmem:[#allocation2 + $0x384] ss:$16 sps:$4 sm:$0xff]   ;;  %v2426_v55 = vld [vmem:[#allocation2 + $0x38c] ss:$16 sps:$4 sm:$0xff]  }
  0x48   :  { %1278 = vmatpush1.bf16.msra.mxu0 %v2335_v56  ;;  %1442 = vmatpush1.bf16.msra.mxu1 %v2336_v57  ;;  %v2421_v56 = vld [vmem:[#allocation2 + $0x380] ss:$16 sps:$4 sm:$0xff]   ;;  %v2424_v57 = vld [vmem:[#allocation2 + $0x388] ss:$16 sps:$4 sm:$0xff]  }
  0x49   :  { %1279 = vmatprep.subr.bf16.mxu0 %v2337_v58  ;;  %1443 = vmatprep.subr.bf16.mxu1 %v2339_v59  ;;  %v2429_v58 = vld [vmem:[#allocation2 + $0x3a4] ss:$16 sps:$4 sm:$0xff]   ;;  %v2432_v59 = vld [vmem:[#allocation2 + $0x3ac] ss:$16 sps:$4 sm:$0xff]  }
  0x4c   :  { %1280 = vmatpush1.bf16.msra.mxu0 %v2341_v60  ;;  %1444 = vmatpush1.bf16.msra.mxu1 %v2342_v61  ;;  %v2427_v60 = vld [vmem:[#allocation2 + $0x3a0] ss:$16 sps:$4 sm:$0xff]   ;;  %v2430_v61 = vld [vmem:[#allocation2 + $0x3a8] ss:$16 sps:$4 sm:$0xff]  }
  0x4d   :  { %1281 = vmatprep.subr.bf16.mxu0 %v2343_v62  ;;  %1445 = vmatprep.subr.bf16.mxu1 %v2345_v63  ;;  %v2435_v62 = vld [vmem:[#allocation2 + $0x3c4] ss:$16 sps:$4 sm:$0xff]   ;;  %v2438_v63 = vld [vmem:[#allocation2 + $0x3cc] ss:$16 sps:$4 sm:$0xff]  }
  0x50   :  { %1282 = vmatpush1.bf16.msra.mxu0 %v2347_v0  ;;  %1446 = vmatpush1.bf16.msra.mxu1 %v2348_v1  ;;  %v2433_v0 = vld [vmem:[#allocation2 + $0x3c0] ss:$16 sps:$4 sm:$0xff]   ;;  %v2436_v1 = vld [vmem:[#allocation2 + $0x3c8] ss:$16 sps:$4 sm:$0xff]  }
  0x51   :  { %1292 = vmatprep.subr.bf16.mxu0 %v2351_v3  ;;  %1456 = vmatprep.subr.bf16.mxu1 %v2354_v4  ;;  %v2444_v3 = vld [vmem:[#allocation2 + $0x3ec] ss:$16 sps:$4 sm:$0xff]   ;;  %v2439_v4 = vld [vmem:[#allocation2 + $0x3e0] ss:$16 sps:$4 sm:$0xff]  }
  0x53   :  { %1284 = vmatmul.mubr.bf16.vlgmr.msra.gmra.mrb[0].mxu0 %v42_v5  ;;  %1448 = vmatmul.mubr.bf16.vlgmr.msra.gmra.mrb[0].mxu1 %v42_v5  ;;  %v2442_v5 = vld [vmem:[#allocation2 + $0x3e8] ss:$16 sps:$4 sm:$0xff]  }
  0x54   :  { %1293 = vmatpush1.bf16.msra.mxu0 %v2349_v6  ;;  %1457 = vmatpush1.bf16.msra.mxu1 %v2352_v7  ;;  %v2447_v6 = vld [vmem:[#allocation2 + $0x404] ss:$16 sps:$4 sm:$0xff]  }
  0x55   :  { %1294 = vmatprep.subr.bf16.mxu0 %v2357_v8  ;;  %1458 = vmatprep.subr.bf16.mxu1 %v2360_v9  ;;  %v37_v7 = vld [vmem:[%s2779_s0 + $0x10] sm:$0xff]  ;;  %v2450_v8 = vld [vmem:[#allocation2 + $0x40c] ss:$16 sps:$4 sm:$0xff]  }
  0x56   :  { %1324 = vmatprep.mubr.bf16.mxu0 %v45_v32  ;;  %1488 = vmatprep.mubr.bf16.mxu1 %v45_v32  ;;  %v2445_v9 = vld [vmem:[#allocation2 + $0x400] ss:$16 sps:$4 sm:$0xff]  }
  0x57   :  { %v2475_v32 = vld [vmem:[#allocation2 + $0x4a0] ss:$16 sps:$4 sm:$0xff]  }
  0x58   :  { %1295 = vmatpush1.bf16.msra.mxu0 %v2355_v10  ;;  %1459 = vmatpush1.bf16.msra.mxu1 %v2358_v11  ;;  %v44_v10 = vpack.c.bf16 %v37_v7, %v37_v7  ;;  %v2448_v11 = vld [vmem:[#allocation2 + $0x408] ss:$16 sps:$4 sm:$0xff]   ;;  %v2540_v7 = vld [vmem:[#allocation2 + $0x5ec] ss:$16 sps:$4 sm:$0xff]  }
  0x59   :  { %1296 = vmatprep.subr.bf16.mxu0 %v2363_v12  ;;  %1460 = vmatprep.subr.bf16.mxu1 %v2366_v13  ;;  %v2453_v12 = vld [vmem:[#allocation2 + $0x424] ss:$16 sps:$4 sm:$0xff]   ;;  %v2456_v13 = vld [vmem:[#allocation2 + $0x42c] ss:$16 sps:$4 sm:$0xff]  }
  0x5c   :  { %1297 = vmatpush1.bf16.msra.mxu0 %v2361_v14  ;;  %1461 = vmatpush1.bf16.msra.mxu1 %v2364_v15  ;;  %v40_v14 = vld [vmem:[%s2779_s0 + $0x28] sm:$0xff] }
  0x5d   :  { %1298 = vmatprep.subr.bf16.mxu0 %v2369_v16  ;;  %1462 = vmatprep.subr.bf16.mxu1 %v2372_v17  ;;  %v47_v15 = vpack.c.bf16 %v40_v14, %v40_v14  ;;  %v2451_v16 = vld [vmem:[#allocation2 + $0x420] ss:$16 sps:$4 sm:$0xff]   ;;  %v2454_v17 = vld [vmem:[#allocation2 + $0x428] ss:$16 sps:$4 sm:$0xff]  }
  0x5e   :  { %v2541_v14 = vld [vmem:[#allocation2 + $0x600] ss:$16 sps:$4 sm:$0xff]  }
  0x60   :  { %1299 = vmatpush1.bf16.msra.mxu0 %v2367_v18  ;;  %1463 = vmatpush1.bf16.msra.mxu1 %v2370_v19  ;;  %v2459_v18 = vld [vmem:[#allocation2 + $0x444] ss:$16 sps:$4 sm:$0xff]   ;;  %v2462_v19 = vld [vmem:[#allocation2 + $0x44c] ss:$16 sps:$4 sm:$0xff]  }
  0x61   :  { %1300 = vmatprep.subr.bf16.mxu0 %v2375_v20  ;;  %1464 = vmatprep.subr.bf16.mxu1 %v2378_v21  ;;  %v2457_v20 = vld [vmem:[#allocation2 + $0x440] ss:$16 sps:$4 sm:$0xff]   ;;  %v2460_v21 = vld [vmem:[#allocation2 + $0x448] ss:$16 sps:$4 sm:$0xff]  }
  0x64   :  { %1301 = vmatpush1.bf16.msra.mxu0 %v2373_v22  ;;  %1465 = vmatpush1.bf16.msra.mxu1 %v2376_v23  ;;  %v2465_v22 = vld [vmem:[#allocation2 + $0x464] ss:$16 sps:$4 sm:$0xff]   ;;  %v2468_v23 = vld [vmem:[#allocation2 + $0x46c] ss:$16 sps:$4 sm:$0xff]  }
  0x65   :  { %1302 = vmatprep.subr.bf16.mxu0 %v2381_v24  ;;  %1466 = vmatprep.subr.bf16.mxu1 %v2384_v25  ;;  %v2463_v24 = vld [vmem:[#allocation2 + $0x460] ss:$16 sps:$4 sm:$0xff]   ;;  %v2466_v25 = vld [vmem:[#allocation2 + $0x468] ss:$16 sps:$4 sm:$0xff]  }
  0x68   :  { %1303 = vmatpush1.bf16.msra.mxu0 %v2379_v26  ;;  %1467 = vmatpush1.bf16.msra.mxu1 %v2382_v27  ;;  %v2471_v26 = vld [vmem:[#allocation2 + $0x484] ss:$16 sps:$4 sm:$0xff]   ;;  %v2474_v27 = vld [vmem:[#allocation2 + $0x48c] ss:$16 sps:$4 sm:$0xff]  }
  0x69   :  { %1304 = vmatprep.subr.bf16.mxu0 %v2387_v28  ;;  %1468 = vmatprep.subr.bf16.mxu1 %v2390_v29  ;;  %v2469_v28 = vld [vmem:[#allocation2 + $0x480] ss:$16 sps:$4 sm:$0xff]   ;;  %v2472_v29 = vld [vmem:[#allocation2 + $0x488] ss:$16 sps:$4 sm:$0xff]  }
  0x6c   :  { %1305 = vmatpush1.bf16.msra.mxu0 %v2385_v31  ;;  %1469 = vmatpush1.bf16.msra.mxu1 %v2388_v33  ;;  %v2480_v31 = vld [vmem:[#allocation2 + $0x4ac] ss:$16 sps:$4 sm:$0xff]   ;;  %v2478_v33 = vld [vmem:[#allocation2 + $0x4a8] ss:$16 sps:$4 sm:$0xff]  }
  0x6d   :  { %1306 = vmatprep.subr.bf16.mxu0 %v2393_v34  ;;  %1470 = vmatprep.subr.bf16.mxu1 %v2396_v35  ;;  %v2483_v34 = vld [vmem:[#allocation2 + $0x4c4] ss:$16 sps:$4 sm:$0xff]   ;;  %v2486_v35 = vld [vmem:[#allocation2 + $0x4cc] ss:$16 sps:$4 sm:$0xff]  }
  0x70   :  { %1307 = vmatpush1.bf16.msra.mxu0 %v2391_v36  ;;  %1471 = vmatpush1.bf16.msra.mxu1 %v2394_v37  ;;  %v2481_v36 = vld [vmem:[#allocation2 + $0x4c0] ss:$16 sps:$4 sm:$0xff]   ;;  %v2484_v37 = vld [vmem:[#allocation2 + $0x4c8] ss:$16 sps:$4 sm:$0xff]  }
  0x71   :  { %1308 = vmatprep.subr.bf16.mxu0 %v2399_v38  ;;  %1472 = vmatprep.subr.bf16.mxu1 %v2402_v39  ;;  %v2489_v38 = vld [vmem:[#allocation2 + $0x4e4] ss:$16 sps:$4 sm:$0xff]   ;;  %v2492_v39 = vld [vmem:[#allocation2 + $0x4ec] ss:$16 sps:$4 sm:$0xff]  }
  0x74   :  { %1309 = vmatpush1.bf16.msra.mxu0 %v2397_v40  ;;  %1473 = vmatpush1.bf16.msra.mxu1 %v2400_v41  ;;  %v2487_v40 = vld [vmem:[#allocation2 + $0x4e0] ss:$16 sps:$4 sm:$0xff]   ;;  %v2490_v41 = vld [vmem:[#allocation2 + $0x4e8] ss:$16 sps:$4 sm:$0xff]  }
  0x75   :  { %1310 = vmatprep.subr.bf16.mxu0 %v2405_v42  ;;  %1474 = vmatprep.subr.bf16.mxu1 %v2408_v43  ;;  %v2495_v42 = vld [vmem:[#allocation2 + $0x504] ss:$16 sps:$4 sm:$0xff]   ;;  %v2498_v43 = vld [vmem:[#allocation2 + $0x50c] ss:$16 sps:$4 sm:$0xff]  }
  0x78   :  { %1311 = vmatpush1.bf16.msra.mxu0 %v2403_v44  ;;  %1475 = vmatpush1.bf16.msra.mxu1 %v2406_v45  ;;  %v2493_v44 = vld [vmem:[#allocation2 + $0x500] ss:$16 sps:$4 sm:$0xff]   ;;  %v2496_v45 = vld [vmem:[#allocation2 + $0x508] ss:$16 sps:$4 sm:$0xff]  }
  0x79   :  { %1312 = vmatprep.subr.bf16.mxu0 %v2411_v46  ;;  %1476 = vmatprep.subr.bf16.mxu1 %v2414_v47  ;;  %v2501_v46 = vld [vmem:[#allocation2 + $0x524] ss:$16 sps:$4 sm:$0xff]   ;;  %v2504_v47 = vld [vmem:[#allocation2 + $0x52c] ss:$16 sps:$4 sm:$0xff]  }
  0x7c   :  { %1313 = vmatpush1.bf16.msra.mxu0 %v2409_v48  ;;  %1477 = vmatpush1.bf16.msra.mxu1 %v2412_v49  ;;  %v2499_v48 = vld [vmem:[#allocation2 + $0x520] ss:$16 sps:$4 sm:$0xff]   ;;  %v2502_v49 = vld [vmem:[#allocation2 + $0x528] ss:$16 sps:$4 sm:$0xff]  }
  0x7d   :  { %1314 = vmatprep.subr.bf16.mxu0 %v2417_v50  ;;  %1478 = vmatprep.subr.bf16.mxu1 %v2420_v51  ;;  %v2507_v50 = vld [vmem:[#allocation2 + $0x544] ss:$16 sps:$4 sm:$0xff]   ;;  %v2510_v51 = vld [vmem:[#allocation2 + $0x54c] ss:$16 sps:$4 sm:$0xff]  }
  0x80   :  { %1315 = vmatpush1.bf16.msra.mxu0 %v2415_v52  ;;  %1479 = vmatpush1.bf16.msra.mxu1 %v2418_v53  ;;  %v2505_v52 = vld [vmem:[#allocation2 + $0x540] ss:$16 sps:$4 sm:$0xff]   ;;  %v2508_v53 = vld [vmem:[#allocation2 + $0x548] ss:$16 sps:$4 sm:$0xff]  }
  0x81   :  { %1316 = vmatprep.subr.bf16.mxu0 %v2423_v54  ;;  %1480 = vmatprep.subr.bf16.mxu1 %v2426_v55  ;;  %v2513_v54 = vld [vmem:[#allocation2 + $0x564] ss:$16 sps:$4 sm:$0xff]   ;;  %v2516_v55 = vld [vmem:[#allocation2 + $0x56c] ss:$16 sps:$4 sm:$0xff]  }
  0x84   :  { %1317 = vmatpush1.bf16.msra.mxu0 %v2421_v56  ;;  %1481 = vmatpush1.bf16.msra.mxu1 %v2424_v57  ;;  %v2511_v56 = vld [vmem:[#allocation2 + $0x560] ss:$16 sps:$4 sm:$0xff]   ;;  %v2514_v57 = vld [vmem:[#allocation2 + $0x568] ss:$16 sps:$4 sm:$0xff]  }
  0x85   :  { %1318 = vmatprep.subr.bf16.mxu0 %v2429_v58  ;;  %1482 = vmatprep.subr.bf16.mxu1 %v2432_v59  ;;  %v2519_v58 = vld [vmem:[#allocation2 + $0x584] ss:$16 sps:$4 sm:$0xff]   ;;  %v2522_v59 = vld [vmem:[#allocation2 + $0x58c] ss:$16 sps:$4 sm:$0xff]  }
  0x88   :  { %1319 = vmatpush1.bf16.msra.mxu0 %v2427_v60  ;;  %1483 = vmatpush1.bf16.msra.mxu1 %v2430_v61  ;;  %v2517_v60 = vld [vmem:[#allocation2 + $0x580] ss:$16 sps:$4 sm:$0xff]   ;;  %v2520_v61 = vld [vmem:[#allocation2 + $0x588] ss:$16 sps:$4 sm:$0xff]  }
  0x89   :  { %1320 = vmatprep.subr.bf16.mxu0 %v2435_v62  ;;  %1484 = vmatprep.subr.bf16.mxu1 %v2438_v63  ;;  %v2525_v62 = vld [vmem:[#allocation2 + $0x5a4] ss:$16 sps:$4 sm:$0xff]   ;;  %v2528_v63 = vld [vmem:[#allocation2 + $0x5ac] ss:$16 sps:$4 sm:$0xff]  }
  0x8c   :  { %1321 = vmatpush1.bf16.msra.mxu0 %v2433_v0  ;;  %1485 = vmatpush1.bf16.msra.mxu1 %v2436_v1  ;;  %v2523_v0 = vld [vmem:[#allocation2 + $0x5a0] ss:$16 sps:$4 sm:$0xff]   ;;  %v2526_v1 = vld [vmem:[#allocation2 + $0x5a8] ss:$16 sps:$4 sm:$0xff]  }
  0x8d   :  { %1322 = vmatprep.subr.bf16.mxu0 %v2441_v2  ;;  %1486 = vmatprep.subr.bf16.mxu1 %v2444_v3  ;;  %v2531_v2 = vld [vmem:[#allocation2 + $0x5c4] ss:$16 sps:$4 sm:$0xff]   ;;  %v2534_v3 = vld [vmem:[#allocation2 + $0x5cc] ss:$16 sps:$4 sm:$0xff]  }
  0x90   :  { %1323 = vmatpush1.bf16.msra.mxu0 %v2439_v4  ;;  %1487 = vmatpush1.bf16.msra.mxu1 %v2442_v5  ;;  %v2529_v4 = vld [vmem:[#allocation2 + $0x5c0] ss:$16 sps:$4 sm:$0xff]   ;;  %v2532_v5 = vld [vmem:[#allocation2 + $0x5c8] ss:$16 sps:$4 sm:$0xff]  }
  0x91   :  { %1333 = vmatprep.subr.bf16.mxu0 %v2447_v6  ;;  %1497 = vmatprep.subr.bf16.mxu1 %v2450_v8  ;;  %v2537_v6 = vld [vmem:[#allocation2 + $0x5e4] ss:$16 sps:$4 sm:$0xff]   ;;  %v2535_v8 = vld [vmem:[#allocation2 + $0x5e0] ss:$16 sps:$4 sm:$0xff]  }
  0x93   :  { %1325 = vmatmul.mubr.bf16.vlgmr.msra.gmra.mrb[0].mxu0 %v44_v10  ;;  %1489 = vmatmul.mubr.bf16.vlgmr.msra.gmra.mrb[0].mxu1 %v44_v10  ;;  %v39_v10 = vld [vmem:[%s2779_s0 + $0x20] sm:$0xff] }
  0x94   :  { %1334 = vmatpush1.bf16.msra.mxu0 %v2445_v9  ;;  %1498 = vmatpush1.bf16.msra.mxu1 %v2448_v11  ;;  %v2538_v9 = vld [vmem:[#allocation2 + $0x5e8] ss:$16 sps:$4 sm:$0xff]   ;;  %v2543_v11 = vld [vmem:[#allocation2 + $0x604] ss:$16 sps:$4 sm:$0xff]  }
  0x95   :  { %1335 = vmatprep.subr.bf16.mxu0 %v2453_v12  ;;  %1499 = vmatprep.subr.bf16.mxu1 %v2456_v13  ;;  %v2546_v12 = vld [vmem:[#allocation2 + $0x60c] ss:$16 sps:$4 sm:$0xff]   ;;  %v46_v13 = vpack.c.bf16 %v39_v10, %v39_v10 }
  0x96   :  { %1365 = vmatprep.mubr.bf16.mxu0 %v47_v15  ;;  %1529 = vmatprep.mubr.bf16.mxu1 %v47_v15  ;;  %v2544_v15 = vld [vmem:[#allocation2 + $0x608] ss:$16 sps:$4 sm:$0xff]  }
  0x98   :  { %1336 = vmatpush1.bf16.msra.mxu0 %v2451_v16  ;;  %1500 = vmatpush1.bf16.msra.mxu1 %v2454_v17  ;;  %v2547_v16 = vld [vmem:[%s2782_s3 + $0x40] sm:$0xff]  }
  0x99   :  { %1337 = vmatprep.subr.bf16.mxu0 %v2459_v18  ;;  %1501 = vmatprep.subr.bf16.mxu1 %v2462_v19  ;;  %v2548_v17 = vld [vmem:[%s2782_s3 + $0xc0] sm:$0xff]   ;;  %v2610_v18 = vmov 0   ;;  %v41_v19 = vld [vmem:[%s2779_s0 + $0x30] sm:$0xff] }
  0x9c   :  { %1338 = vmatpush1.bf16.msra.mxu0 %v2457_v20  ;;  %1502 = vmatpush1.bf16.msra.mxu1 %v2460_v21  ;;  %v48_v20 = vpack.c.bf16 %v41_v19, %v41_v19  ;;  %v2549_v21 = vld [vmem:[%s2782_s3] sm:$0xff]  }
  0x9d   :  { %1339 = vmatprep.subr.bf16.mxu0 %v2465_v22  ;;  %1503 = vmatprep.subr.bf16.mxu1 %v2468_v23  ;;  %v2550_v22 = vld [vmem:[%s2782_s3 + $0x80] sm:$0xff]   ;;  %v2551_v23 = vld [vmem:[%s2782_s3 + $0x48] sm:$0xff]  }
  0xa0   :  { %1340 = vmatpush1.bf16.msra.mxu0 %v2463_v24  ;;  %1504 = vmatpush1.bf16.msra.mxu1 %v2466_v25  ;;  %v2552_v24 = vld [vmem:[%s2782_s3 + $0xc8] sm:$0xff]  }
  0xa1   :  { %1341 = vmatprep.subr.bf16.mxu0 %v2471_v26  ;;  %1505 = vmatprep.subr.bf16.mxu1 %v2474_v27  ;;  %v2553_v25 = vld [vmem:[%s2782_s3 + $0x8] sm:$0xff]   ;;  %v2555_v27 = vld [vmem:[%s2782_s3 + $0x50] sm:$0xff]  }
  0xa2   :  { %v2554_v26 = vld [vmem:[%s2782_s3 + $0x88] sm:$0xff]  }
  0xa4   :  { %1342 = vmatpush1.bf16.msra.mxu0 %v2469_v28  ;;  %1506 = vmatpush1.bf16.msra.mxu1 %v2472_v29  ;;  %v2556_v28 = vld [vmem:[%s2782_s3 + $0xd0] sm:$0xff]  }
  0xa5   :  { %1343 = vmatprep.subr.bf16.mxu0 %v2477_v30  ;;  %1507 = vmatprep.subr.bf16.mxu1 %v2480_v31  ;;  %v2557_v29 = vld [vmem:[%s2782_s3 + $0x10] sm:$0xff]   ;;  %v2559_v31 = vld [vmem:[%s2782_s3 + $0x58] sm:$0xff]  }
  0xa6   :  { %v2558_v30 = vld [vmem:[%s2782_s3 + $0x90] sm:$0xff]  }
  0xa8   :  { %1344 = vmatpush1.bf16.msra.mxu0 %v2475_v32  ;;  %1508 = vmatpush1.bf16.msra.mxu1 %v2478_v33  ;;  %v2560_v32 = vld [vmem:[%s2782_s3 + $0xd8] sm:$0xff]  }
  0xa9   :  { %1345 = vmatprep.subr.bf16.mxu0 %v2483_v34  ;;  %1509 = vmatprep.subr.bf16.mxu1 %v2486_v35  ;;  %v2561_v33 = vld [vmem:[%s2782_s3 + $0x18] sm:$0xff]   ;;  %v2563_v35 = vld [vmem:[%s2782_s3 + $0x60] sm:$0xff]  }
  0xaa   :  { %v2562_v34 = vld [vmem:[%s2782_s3 + $0x98] sm:$0xff]  }
  0xac   :  { %1346 = vmatpush1.bf16.msra.mxu0 %v2481_v36  ;;  %1510 = vmatpush1.bf16.msra.mxu1 %v2484_v37  ;;  %v2564_v36 = vld [vmem:[%s2782_s3 + $0xe0] sm:$0xff]  }
  0xad   :  { %1347 = vmatprep.subr.bf16.mxu0 %v2489_v38  ;;  %1511 = vmatprep.subr.bf16.mxu1 %v2492_v39  ;;  %v2565_v37 = vld [vmem:[%s2782_s3 + $0x20] sm:$0xff]   ;;  %v2567_v39 = vld [vmem:[%s2782_s3 + $0x68] sm:$0xff]  }
  0xae   :  { %v2566_v38 = vld [vmem:[%s2782_s3 + $0xa0] sm:$0xff]  }
  0xb0   :  { %1348 = vmatpush1.bf16.msra.mxu0 %v2487_v40  ;;  %1512 = vmatpush1.bf16.msra.mxu1 %v2490_v41  ;;  %v2568_v40 = vld [vmem:[%s2782_s3 + $0xe8] sm:$0xff]  }
  0xb1   :  { %1349 = vmatprep.subr.bf16.mxu0 %v2495_v42  ;;  %1513 = vmatprep.subr.bf16.mxu1 %v2498_v43  ;;  %v2569_v41 = vld [vmem:[%s2782_s3 + $0x28] sm:$0xff]   ;;  %v2571_v43 = vld [vmem:[%s2782_s3 + $0x70] sm:$0xff]  }
  0xb2   :  { %v2570_v42 = vld [vmem:[%s2782_s3 + $0xa8] sm:$0xff]  }
  0xb4   :  { %1350 = vmatpush1.bf16.msra.mxu0 %v2493_v44  ;;  %1514 = vmatpush1.bf16.msra.mxu1 %v2496_v45  ;;  %v2572_v44 = vld [vmem:[%s2782_s3 + $0xf0] sm:$0xff]  }
  0xb5   :  { %1351 = vmatprep.subr.bf16.mxu0 %v2501_v46  ;;  %1515 = vmatprep.subr.bf16.mxu1 %v2504_v47  ;;  %v2573_v45 = vld [vmem:[%s2782_s3 + $0x30] sm:$0xff]   ;;  %v2575_v47 = vld [vmem:[%s2782_s3 + $0x78] sm:$0xff]  }
  0xb6   :  { %v2574_v46 = vld [vmem:[%s2782_s3 + $0xb0] sm:$0xff]  }
  0xb8   :  { %1352 = vmatpush1.bf16.msra.mxu0 %v2499_v48  ;;  %1516 = vmatpush1.bf16.msra.mxu1 %v2502_v49  ;;  %v2576_v48 = vld [vmem:[%s2782_s3 + $0xf8] sm:$0xff]  }
  0xb9   :  { %1353 = vmatprep.subr.bf16.mxu0 %v2507_v50  ;;  %1517 = vmatprep.subr.bf16.mxu1 %v2510_v51  ;;  %v2577_v49 = vld [vmem:[%s2782_s3 + $0x38] sm:$0xff]   ;;  %v247_v51 = vlaneseq }
  0xba   :  { %v2578_v50 = vld [vmem:[%s2782_s3 + $0xb8] sm:$0xff]  }
  0xbc   :  { %1354 = vmatpush1.bf16.msra.mxu0 %v2505_v52  ;;  %1518 = vmatpush1.bf16.msra.mxu1 %v2508_v53  ;;  %v248_v52 = vshrl.u32 %v247_v51, 7 }
  0xbd   :  { %1355 = vmatprep.subr.bf16.mxu0 %v2513_v54  ;;  %1519 = vmatprep.subr.bf16.mxu1 %v2516_v55  ;;  %v245_v55 = vld [vmem:[%s2781_s2] sm:$0xf] }
  0xbe   :  { %v249_v53 = vsub.s32 0, %v248_v52  ;;  %v257_v54 = vsub.s32 2, %v248_v52 }
  0xc0   :  { %1356 = vmatpush1.bf16.msra.mxu0 %v2511_v56  ;;  %1520 = vmatpush1.bf16.msra.mxu1 %v2514_v57  ;;  %v253_v56 = vsub.s32 1, %v248_v52  ;;  %v261_v57 = vsub.s32 3, %v248_v52 }
  0xc1   :  { %1357 = vmatprep.subr.bf16.mxu0 %v2519_v58  ;;  %1521 = vmatprep.subr.bf16.mxu1 %v2522_v59  ;;  %v250_v58 = vrot.slane %v245_v55, %v249_v53  ;;  %v258_v59 = vrot.slane %v245_v55, %v257_v54 }
  0xc4   :  { %1358 = vmatpush1.bf16.msra.mxu0 %v2517_v60  ;;  %1522 = vmatpush1.bf16.msra.mxu1 %v2520_v61  ;;  %v254_v60 = vrot.slane %v245_v55, %v253_v56  ;;  %v262_v61 = vrot.slane %v245_v55, %v261_v57 }
  0xc5   :  { %1359 = vmatprep.subr.bf16.mxu0 %v2525_v62  ;;  %1523 = vmatprep.subr.bf16.mxu1 %v2528_v63 }
  0xc8   :  { %1360 = vmatpush1.bf16.msra.mxu0 %v2523_v0  ;;  %1524 = vmatpush1.bf16.msra.mxu1 %v2526_v1 }
  0xc9   :  { %1361 = vmatprep.subr.bf16.mxu0 %v2531_v2  ;;  %1525 = vmatprep.subr.bf16.mxu1 %v2534_v3 }
  0xcc   :  { %1362 = vmatpush1.bf16.msra.mxu0 %v2529_v4  ;;  %1526 = vmatpush1.bf16.msra.mxu1 %v2532_v5 }
  0xcd   :  { %1363 = vmatprep.subr.bf16.mxu0 %v2537_v6  ;;  %1527 = vmatprep.subr.bf16.mxu1 %v2540_v7 }
  0xd0   :  { %1364 = vmatpush1.bf16.msra.mxu0 %v2535_v8  ;;  %1528 = vmatpush1.bf16.msra.mxu1 %v2538_v9 }
  0xd1   :  { %1374 = vmatprep.subr.bf16.mxu0 %v2543_v11  ;;  %1538 = vmatprep.subr.bf16.mxu1 %v2546_v12 }
  0xd3   :  { %1366 = vmatmul.mubr.bf16.vlgmr.msra.gmra.mrb[0].mxu0 %v46_v13  ;;  %1530 = vmatmul.mubr.bf16.vlgmr.msra.gmra.mrb[0].mxu1 %v46_v13 }
  0xd4   :  { %1375 = vmatpush1.bf16.msra.mxu0 %v2541_v14  ;;  %1539 = vmatpush1.bf16.msra.mxu1 %v2544_v15 }
  0xd5   :  { %1406 = vmatprep.mubr.bf16.mxu0 %v2610_v18  ;;  %1570 = vmatprep.mubr.bf16.mxu1 %v2610_v18 }
  0xd6   :  { %2177 = vmatprep.subr.bf16.mxu0 %v2547_v16  ;;  %2199 = vmatprep.subr.bf16.mxu1 %v2548_v17 }
  0xdf   :  { %2142 = vmatmul.mubr.msk.bf16.vlgmr.msra.gmra.mrb[0].mxu0 %vm1247_vm0, %v48_v20  ;;  %2143 = vmatmul.mubr.msk.bf16.vlgmr.msra.gmra.mrb[0].mxu1 %vm1247_vm0, %v48_v20  ;;  %v2144_v20 = vld [vmem:[%s2783_s4] ss:$0 sm:$0xff] }
  0xe0   :  { %2178 = vmatpush3.bf16.msra.mxu0 %v2549_v21  ;;  %2200 = vmatpush3.bf16.msra.mxu1 %v2550_v22 }
  0xe1   :  { %2179 = vmatprep.subr.bf16.mxu0 %v2551_v23  ;;  %2201 = vmatprep.subr.bf16.mxu1 %v2552_v24 }
  0xe4   :  { %2180 = vmatpush3.bf16.msra.mxu0 %v2553_v25  ;;  %2202 = vmatpush3.bf16.msra.mxu1 %v2554_v26 }
  0xe5   :  { %2181 = vmatprep.subr.bf16.mxu0 %v2555_v27  ;;  %2203 = vmatprep.subr.bf16.mxu1 %v2556_v28 }
  0xe8   :  { %2182 = vmatpush3.bf16.msra.mxu0 %v2557_v29  ;;  %2204 = vmatpush3.bf16.msra.mxu1 %v2558_v30 }
  0xe9   :  { %2183 = vmatprep.subr.bf16.mxu0 %v2559_v31  ;;  %2205 = vmatprep.subr.bf16.mxu1 %v2560_v32 }
  0xec   :  { %2184 = vmatpush3.bf16.msra.mxu0 %v2561_v33  ;;  %2206 = vmatpush3.bf16.msra.mxu1 %v2562_v34 }
  0xed   :  { %2185 = vmatprep.subr.bf16.mxu0 %v2563_v35  ;;  %2207 = vmatprep.subr.bf16.mxu1 %v2564_v36 }
  0xf0   :  { %2186 = vmatpush3.bf16.msra.mxu0 %v2565_v37  ;;  %2208 = vmatpush3.bf16.msra.mxu1 %v2566_v38 }
  0xf1   :  { %2187 = vmatprep.subr.bf16.mxu0 %v2567_v39  ;;  %2209 = vmatprep.subr.bf16.mxu1 %v2568_v40 }
  0xf4   :  { %2188 = vmatpush3.bf16.msra.mxu0 %v2569_v41  ;;  %2210 = vmatpush3.bf16.msra.mxu1 %v2570_v42 }
  0xf5   :  { %2189 = vmatprep.subr.bf16.mxu0 %v2571_v43  ;;  %2211 = vmatprep.subr.bf16.mxu1 %v2572_v44 }
  0xf8   :  { %2190 = vmatpush3.bf16.msra.mxu0 %v2573_v45  ;;  %2212 = vmatpush3.bf16.msra.mxu1 %v2574_v46 }
  0xf9   :  { %2191 = vmatprep.subr.bf16.mxu0 %v2575_v47  ;;  %2213 = vmatprep.subr.bf16.mxu1 %v2576_v48 }
  0xfc   :  { %2192 = vmatpush3.bf16.msra.mxu0 %v2577_v49  ;;  %2214 = vmatpush3.bf16.msra.mxu1 %v2578_v50 }
 0x1b2   :  { %v1408_v62 = vpop.f32.mrb[0].mxu0  ;;  %v1572_v63 = vpop.f32.mrb[0].mxu1 }
 0x1b3   :  { %v2221_v0 = vadd.f32 %v1408_v62, %v250_v58  ;;  %v2223_v1 = vadd.f32 %v1572_v63, %v258_v59  ;;  %v1410_v2 = vpop.f32.mrb[1].mxu0  ;;  %v1574_v3 = vpop.f32.mrb[1].mxu1 }
 0x1b4   :  { %v2222_v4 = vadd.f32 %v1410_v2, %v254_v60  ;;  %v2224_v5 = vadd.f32 %v1574_v3, %v262_v61  ;;  %v1412_v6 = vpop.f32.mrb[2].mxu0  ;;  %v1576_v7 = vpop.f32.mrb[2].mxu1 }
 0x1b5   :  { %v1579_v8 = vmax.f32 %v2221_v0, 0.0  ;;  %v1581_v9 = vmax.f32 %v2223_v1, 0.0  ;;  %v1413_v10 = vpop.f32.mrb[3].mxu0  ;;  %v1577_v11 = vpop.f32.mrb[3].mxu1 }
 0x1b6   :  { %v1580_v12 = vmax.f32 %v2222_v4, 0.0  ;;  %v1582_v13 = vmax.f32 %v2224_v5, 0.0 }
 0x1b7   :  { %v1583_v16 = vpack.c.bf16 %v1579_v8, %v1579_v8  ;;  %v1585_v17 = vpack.c.bf16 %v1581_v9, %v1581_v9 }
 0x1b8   :  { %v1584_v14 = vpack.c.bf16 %v1580_v12, %v1580_v12  ;;  %v1586_v15 = vpack.c.bf16 %v1582_v13, %v1582_v13 }
 0x1ba   :  { %1882 = vmatprep.mubr.bf16.mxu0 %v1584_v14  ;;  %1922 = vmatprep.mubr.bf16.mxu1 %v1586_v15 }
 0x1bb   :  { %1883 = vmatmul.mubr.bf16.vlgmr.msra.gmra.mrb[4].mxu0 %v1583_v16  ;;  %1923 = vmatmul.mubr.bf16.vlgmr.msra.gmra.mrb[4].mxu1 %v1585_v17 }
 0x28e   :  { %v2193_v18 = vpop.f32.mrb[4].mxu0  ;;  %v2215_v19 = vpop.f32.mrb[4].mxu1 }
 0x28f   :  { %v2194_v21 = vpop.f32.mrb[5].mxu0  ;;  %v2216_v22 = vpop.f32.mrb[5].mxu1 }
 0x290   :  { %v2195_v23 = vadd.f32 %v2194_v21, %v2193_v18  ;;  %v2217_v24 = vadd.f32 %v2216_v22, %v2215_v19  ;;  %v2196_v25 = vpop.f32.mrb[6].mxu0  ;;  %v2218_v26 = vpop.f32.mrb[6].mxu1 }
 0x291   :  { %v2197_v27 = vpop.f32.mrb[7].mxu0  ;;  %v2219_v28 = vpop.f32.mrb[7].mxu1 }
 0x292   :  { %v1885_v29 = vadd.f32 %v2195_v23, %v2144_v20 }
 0x294   :  { %v1925_v30 = vadd.f32 %v2217_v24, %v1885_v29 }
 0x296   :  { %1930 = vmax.xlane.f32.xlu0 %v1925_v30 }
 0x323   :  { %v1931_v31 = vpop.xlane.xlu0 %1930 }
 0x324   :  { %v1932_v32 = vsub.f32 %v1925_v30, %v1931_v31 }
 0x326   :  { %v1933_v33 = vmul.f32 1.442695, %v1932_v32 }
 0x328   :  { %2579 = vpow2.f32 %v1933_v33 }
 0x332   :  { %v2580_v34 = vpop.eup %2579 }
 0x333   :  { %1935 = vadd.xlane.f32.xlu0 %v2580_v34 }
 0x3c0   :  { %v1936_v35 = vpop.xlane.xlu0 %1935 }
 0x3c1   :  { %2581 = vlog2.f32 %v1936_v35 }
 0x3cb   :  { %v2582_v36 = vpop.eup %2581 }
 0x3cc   :  { %v1938_v37 = vmul.f32 0.6931472, %v2582_v36 }
 0x3ce   :  { %v1939_v38 = vsub.f32 %v1932_v32, %v1938_v37 }
 0x3d0   :  { %1940 = vst [vmem:[%s2784_s5] sm:$0xff] %v1939_v38 }
 0x3d1   :  { %1945 = vsyncpa [#allocation3], 1 }

</bundles_post_ra>
